<compile_context>
chip_gen: v7x
topology: tpu7x:2x2x1
jax: 0.10.0
libtpu: 0.0.40
codegen_flags: <defaults>
</compile_context>

<pallas_src>
import functools

import jax
import jax.numpy as jnp
from jax.experimental import pallas as pl
from jax.experimental.pallas import tpu as pltpu


def _round_up(n: int, m: int) -> int:
    return ((n + m - 1) // m) * m


def _policy_mlp_kernel(x_ref, w1_ref, b1_ref, w2_ref, b2_ref, o_ref, *, chunk):
    # Shapes (batch on lanes):
    #   x:  [4, TB]    w1: [32, 4]    b1: [32, 1]
    #   w2: [2, 32]    b2: [2, 1]     o:  [2, TB]
    w1 = w1_ref[...]
    b1 = b1_ref[...]
    w2 = w2_ref[...]
    b2 = b2_ref[...]
    tb = x_ref.shape[-1]
    # Chunk the lane (batch) axis with static slices so the [32, TB] hidden
    # activation never materializes in VMEM -- only a [32, chunk] temporary is
    # live per iteration (review: "size TB around the hidden ... or eliminate it").
    for c in range(tb // chunk):
        lo = c * chunk
        xc = x_ref[:, lo:lo + chunk]                                    # [4, chunk]
        h = jnp.dot(w1, xc, preferred_element_type=jnp.float32)         # MXU, f32 acc
        h = jnp.tanh(h + b1)                                            # EUP tanh on f32
        h = h.astype(w2.dtype)                                          # feed 2nd MXU pass
        out = jnp.dot(w2, h, preferred_element_type=jnp.float32) + b2   # [2, chunk]
        o_ref[:, lo:lo + chunk] = out.astype(o_ref.dtype)


def policy_mlp_feature_major(x_fm, w1, b1, w2, b2, *,
                             block_b=65536, chunk_b=2048,
                             compute_dtype=jnp.bfloat16,
                             out_dtype=jnp.float32,
                             extra_input_buffering=True):
    """Lane-dense forward pass.  x_fm: [4, B] feature-major -> logits [2, B].

    Preferred entry point: keep rollout observations feature-major and consume
    logits as [2, B] downstream so no extra HBM transpose passes are paid
    (review: "kill the wrapper-side HBM passes").

    NOTE: with compute_dtype=bfloat16 expect ~1e-2 relative error vs a float32
    reference (fine for policy gradients).  Padded batch lanes hold tanh(b1)
    garbage by construction and are sliced off -- do not run NaN/inf checks on
    the un-sliced [2, B_pad] output.
    """
    assert x_fm.shape[0] == 4 and w1.shape == (32, 4) and w2.shape == (2, 32)
    B = x_fm.shape[1]

    # Tile geometry: TB (grid tile) is a multiple of chunk; chunk is a multiple
    # of 128 so every slice in the kernel stays lane-aligned.
    B_lane = _round_up(max(B, 1), 128)
    tb0 = _round_up(min(block_b, B_lane), 128)
    chunk = min(_round_up(chunk_b, 128), tb0)
    TB = _round_up(tb0, chunk)
    B_pad = _round_up(B_lane, TB)
    n_steps = B_pad // TB

    if B_pad != B:
        x_fm = jnp.pad(x_fm, ((0, 0), (0, B_pad - B)))
    # TODO(synk): ideally the compute_dtype cast happens where x is produced
    # (rollout buffer) instead of as a separate pass here.
    x_c = x_fm.astype(compute_dtype)
    w1_c = w1.astype(compute_dtype)
    w2_c = w2.astype(compute_dtype)
    b1_2d = b1.reshape(32, 1).astype(jnp.float32)
    b2_2d = b2.reshape(2, 1).astype(jnp.float32)

    # Triple-buffer the x stream only when there are enough grid steps for it
    # to matter (per-step compute is ~nothing, so a 3rd buffer covers DMA jitter).
    n_x_buffers = 3 if (extra_input_buffering and n_steps >= 4) else 2
    x_spec_kwargs = {}
    if n_x_buffers == 3:
        x_spec_kwargs["pipeline_mode"] = pl.Buffered(3)
    x_spec = pl.BlockSpec((4, TB), lambda i: (0, i), **x_spec_kwargs)

    resident = lambda shape: pl.BlockSpec(shape, lambda i: (0, 0))  # DMA'd once

    # Estimated VMEM footprint; raise the scoped limit only when needed
    # (smallest scoped default is 16 MiB on v5e; v7x has 64 MiB physical).
    c_bytes = jnp.dtype(compute_dtype).itemsize
    o_bytes = jnp.dtype(out_dtype).itemsize
    est = (n_x_buffers * 4 * TB * c_bytes          # buffered x tiles
           + 2 * 2 * TB * o_bytes                  # double-buffered out tiles
           + 32 * chunk * (4 + c_bytes)            # hidden chunk (f32 + cast)
           + 8 * chunk * 4                         # misc chunk temporaries
           + (32 * 4 + 2 * 32) * c_bytes + 34 * 4)  # resident weights/biases
    compiler_kwargs = dict(dimension_semantics=("parallel",))
    if est > 12 * (1 << 20):
        compiler_kwargs["vmem_limit_bytes"] = int(est * 1.25) + (4 << 20)

    out_fm = pl.pallas_call(
        functools.partial(_policy_mlp_kernel, chunk=chunk),
        out_shape=jax.ShapeDtypeStruct((2, B_pad), out_dtype),
        grid=(n_steps,),
        in_specs=[
            x_spec,
            resident(w1_c.shape),
            resident(b1_2d.shape),
            resident(w2_c.shape),
            resident(b2_2d.shape),
        ],
        out_specs=pl.BlockSpec((2, TB), lambda i: (0, i)),
        compiler_params=pltpu.CompilerParams(**compiler_kwargs),
    )(x_c, w1_c, b1_2d, w2_c, b2_2d)

    return out_fm[:, :B] if B_pad != B else out_fm


def policy_mlp(x, w1, b1, w2, b2, *, use_pallas=None, **kwargs):
    """PyTorch-layout forward pass: x [B, 4] -> logits [B, 2].

    This compatibility wrapper pays one extra HBM pass for x.T and one for the
    output transpose; rollout code should call policy_mlp_feature_major
    directly with feature-major observations.
    """
    B = x.shape[0]
    if use_pallas is None:
        # Below a few thousand rows, XLA fusion beats kernel launch + the
        # wrapper transpose passes (review: raise threshold from 512).
        use_pallas = B >= 4096
    if not use_pallas:
        return jnp.tanh(x @ w1.T + b1) @ w2.T + b2
    out_fm = policy_mlp_feature_major(x.T, w1, b1, w2, b2, **kwargs)
    return out_fm.T


def _init_params(key):
    # Deterministic init mimicking PyTorch nn.Linear default:
    # U(-1/sqrt(fan_in), 1/sqrt(fan_in)) for both weights and biases.
    k1, k2, k3, k4 = jax.random.split(key, 4)
    bound1 = 1.0 / jnp.sqrt(4.0)
    bound2 = 1.0 / jnp.sqrt(32.0)
    w1 = jax.random.uniform(k1, (32, 4), jnp.float32, -bound1, bound1)
    b1 = jax.random.uniform(k2, (32,), jnp.float32, -bound1, bound1)
    w2 = jax.random.uniform(k3, (2, 32), jnp.float32, -bound2, bound2)
    b2 = jax.random.uniform(k4, (2,), jnp.float32, -bound2, bound2)
    return w1, b1, w2, b2


if __name__ == "__main__":
    key = jax.random.PRNGKey(0)
    k_params, k_x1, k_x2 = jax.random.split(key, 3)
    w1, b1, w2, b2 = _init_params(k_params)

    def ref_fwd(xb):
        return jnp.tanh(xb @ w1.T + b1) @ w2.T + b2

    # 1) Small PyTorch-layout batch, f32 compute, Pallas path forced
    #    (single grid step, single chunk) -- tight tolerance check.
    x_small = jax.random.normal(k_x1, (8, 4), jnp.float32)
    logits = policy_mlp(x_small, w1, b1, w2, b2, use_pallas=True,
                        compute_dtype=jnp.float32)
    logits = jax.block_until_ready(logits)
    assert logits.shape == (8, 2)
    assert jnp.allclose(logits, ref_fwd(x_small), atol=1e-5, rtol=1e-5), \
        "f32 path mismatch vs reference"

    # 2) Feature-major rollout-style batch, default bf16 compute, multi-step
    #    grid (4 steps -> Buffered(3) x stream) with 2 sub-chunks per step.
    B2 = 4096
    x_big = jax.random.normal(k_x2, (B2, 4), jnp.float32)
    out_fm = policy_mlp_feature_major(x_big.T, w1, b1, w2, b2,
                                      block_b=1024, chunk_b=512)
    out_fm = jax.block_until_ready(out_fm)
    assert out_fm.shape == (2, B2)
    # bf16 inputs/weights -> loose sanity tolerance vs the f32 reference.
    assert jnp.allclose(out_fm.T, ref_fwd(x_big), atol=1e-1, rtol=1e-1), \
        "bf16 path mismatch vs reference (beyond bf16 tolerance)"

    print("KERNEL_OK")
</pallas_src>

<mosaic_0001>
module attributes {stable_mosaic.version = 11 : i64} {
  func.func @_policy_mlp_kernel(%arg0: i32, %arg1: memref<4x128xf32, #tpu.memory_space<vmem>>, %arg2: memref<32x4xf32, #tpu.memory_space<vmem>>, %arg3: memref<32x1xf32, #tpu.memory_space<vmem>>, %arg4: memref<2x32xf32, #tpu.memory_space<vmem>>, %arg5: memref<2x1xf32, #tpu.memory_space<vmem>>, %arg6: memref<2x128xf32, #tpu.memory_space<vmem>>) attributes {dimension_semantics = [#tpu.dimension_semantics<parallel>], iteration_bounds = array<i64: 1>, scalar_prefetch = 0 : i64, scratch_operands = 0 : i64, tpu.core_type = #tpu.core_type<tc>, window_params = [{transform_indices = @transform_0, window_bounds = array<i64: 4, 128>}, {pipeline_mode = #tpu.pipeline_mode<synchronous>, transform_indices = @transform_1, window_bounds = array<i64: 32, 4>}, {pipeline_mode = #tpu.pipeline_mode<synchronous>, transform_indices = @transform_2, window_bounds = array<i64: 32, 1>}, {pipeline_mode = #tpu.pipeline_mode<synchronous>, transform_indices = @transform_3, window_bounds = array<i64: 2, 32>}, {pipeline_mode = #tpu.pipeline_mode<synchronous>, transform_indices = @transform_4, window_bounds = array<i64: 2, 1>}, {transform_indices = @transform_5, window_bounds = array<i64: 2, 128>}]} {
    %c0 = arith.constant 0 : index
    %c0_0 = arith.constant 0 : index
    %0 = vector.load %arg2[%c0, %c0_0] : memref<32x4xf32, #tpu.memory_space<vmem>>, vector<32x4xf32>
    %c0_1 = arith.constant 0 : index
    %c0_2 = arith.constant 0 : index
    %1 = vector.load %arg3[%c0_1, %c0_2] : memref<32x1xf32, #tpu.memory_space<vmem>>, vector<32x1xf32>
    %c0_3 = arith.constant 0 : index
    %c0_4 = arith.constant 0 : index
    %2 = vector.load %arg4[%c0_3, %c0_4] : memref<2x32xf32, #tpu.memory_space<vmem>>, vector<2x32xf32>
    %c0_5 = arith.constant 0 : index
    %c0_6 = arith.constant 0 : index
    %3 = vector.load %arg5[%c0_5, %c0_6] : memref<2x1xf32, #tpu.memory_space<vmem>>, vector<2x1xf32>
    %c0_7 = arith.constant 0 : index
    %c0_8 = arith.constant 0 : index
    %4 = vector.load %arg1[%c0_7, %c0_8] : memref<4x128xf32, #tpu.memory_space<vmem>>, vector<4x128xf32>
    %cst = arith.constant dense<0.000000e+00> : vector<32x128xf32>
    %5 = tpu.matmul %0, %4, %cst {dimension_numbers = #tpu.dot_dimension_numbers<[1], [0], [0], [1], [0, 0, 1, 1], [], []>} : vector<32x4xf32>, vector<4x128xf32>, vector<32x128xf32> -> vector<32x128xf32>
    %6 = vector.broadcast %1 : vector<32x1xf32> to vector<32x128xf32>
    %7 = arith.addf %5, %6 : vector<32x128xf32>
    %8 = math.tanh %7 : vector<32x128xf32>
    %cst_9 = arith.constant dense<0.000000e+00> : vector<2x128xf32>
    %9 = tpu.matmul %2, %8, %cst_9 {dimension_numbers = #tpu.dot_dimension_numbers<[1], [0], [0], [1], [0, 0, 1, 1], [], []>} : vector<2x32xf32>, vector<32x128xf32>, vector<2x128xf32> -> vector<2x128xf32>
    %10 = vector.broadcast %3 : vector<2x1xf32> to vector<2x128xf32>
    %11 = arith.addf %9, %10 : vector<2x128xf32>
    %c0_10 = arith.constant 0 : index
    %c0_11 = arith.constant 0 : index
    %12 = vector.load %arg6[%c0_10, %c0_11] : memref<2x128xf32, #tpu.memory_space<vmem>>, vector<2x128xf32>
    tpu.vector_store %arg6[%c0_10, %c0_11], %11 {strides = array<i32>} : memref<2x128xf32, #tpu.memory_space<vmem>>, vector<2x128xf32>,
    return
  }
  func.func @transform_0(%arg0: i32) -> (i32, i32) {
    %c0_i32 = arith.constant 0 : i32
    %c0_i32_0 = arith.constant 0 : i32
    return %c0_i32, %arg0 : i32, i32
  }
  func.func @transform_1(%arg0: i32) -> (i32, i32) {
    %c0_i32 = arith.constant 0 : i32
    %c0_i32_0 = arith.constant 0 : i32
    %c0_i32_1 = arith.constant 0 : i32
    return %c0_i32, %c0_i32_0 : i32, i32
  }
  func.func @transform_2(%arg0: i32) -> (i32, i32) {
    %c0_i32 = arith.constant 0 : i32
    %c0_i32_0 = arith.constant 0 : i32
    %c0_i32_1 = arith.constant 0 : i32
    return %c0_i32, %c0_i32_0 : i32, i32
  }
  func.func @transform_3(%arg0: i32) -> (i32, i32) {
    %c0_i32 = arith.constant 0 : i32
    %c0_i32_0 = arith.constant 0 : i32
    %c0_i32_1 = arith.constant 0 : i32
    return %c0_i32, %c0_i32_0 : i32, i32
  }
  func.func @transform_4(%arg0: i32) -> (i32, i32) {
    %c0_i32 = arith.constant 0 : i32
    %c0_i32_0 = arith.constant 0 : i32
    %c0_i32_1 = arith.constant 0 : i32
    return %c0_i32, %c0_i32_0 : i32, i32
  }
  func.func @transform_5(%arg0: i32) -> (i32, i32) {
    %c0_i32 = arith.constant 0 : i32
    %c0_i32_0 = arith.constant 0 : i32
    return %c0_i32, %arg0 : i32, i32
  }
}

</mosaic_0001>

<bundles_post_ra>
// kernel: tpu_custom_call.1
= control target key start
LH: loop header
LB: loop body
LE: loop exit
PB: predicated region body
PF: predicated region fallthrough
CT: control target
= control target key end

     0   :  { %vm65_vm0 = vcmask 1043456   ;;  %vm52_vm1 = vcmask 31744   ;;  %v332_v5 = vmov 0   ;;  %s416_s0 = inlined_call_operand.vmem [shape: f32[4,128], index: 0, kind: input, shape index: {}]   ;;  %s417_s1 = inlined_call_operand.vmem [shape: f32[32,4], index: 1, kind: input, shape index: {}]   ;;  %s418_s2 = inlined_call_operand.vmem [shape: f32[32,1], index: 2, kind: input, shape index: {}]   ;;  %s419_s3 = inlined_call_operand.vmem [shape: f32[2,32], index: 3, kind: input, shape index: {}]   ;;  %s420_s4 = inlined_call_operand.vmem [shape: f32[2,1], index: 4, kind: input, shape index: {}]   ;;  %s421_s5 = inlined_call_operand.hbm [shape: f32[2,128], index: 5, kind: output, shape index: {}]  }
   0x1   :  { %v31_v0 = vld [vmem:[%s416_s0] sm:$0xf]  ;;  %v22_v2 = vld [vmem:[%s417_s1 + $0x8] sm:$0xff]  ;;  %v23_v3 = vld [vmem:[%s417_s1 + $0x10] sm:$0xff]  ;;  %298 = vset.pattern.permute.xlu0 %v332_v5 }
   0x2   :  { %v21_v1 = vld [vmem:[%s417_s1] sm:$0xff]  ;;  %268 = vmatprep.subr.msk.mxu0 %vm65_vm0, %v31_v0  ;;  %v27_v6 = vld [vmem:[%s418_s2 + $0x10] sm:$0xff] }
   0x3   :  { %270 = vmatprep.mubr.msk.f32.mxu0 %vm52_vm1, %v21_v1  ;;  %v25_v4 = vld [vmem:[%s418_s2] sm:$0xff]  ;;  %269 = vmatpush3.msk.msra.mxu0 %vm65_vm0, %v31_v0 }
   0x4   :  { %271 = vmatmul.mubr.msk.f32.vlgmr.msra.gmra.mrb[0].mxu0 %vm52_vm1, %v22_v2  ;;  %34 = vperm.xlu0 %298, %v25_v4  }
   0x5   :  { %10 = vsyncpa [#allocation3], 0  ;;  %273 = vmatprep.mubr.msk.f32.mxu0 %vm52_vm1, %v23_v3  ;;  %v24_v7 = vld [vmem:[%s417_s1 + $0x18] sm:$0xff]  ;;  %v26_v8 = vld [vmem:[%s418_s2 + $0x8] sm:$0xff]  ;;  %299 = vset.pattern.permute.xlu1 %v332_v5  ;;  %v333_v11 = vmov 0.0|0.0   ;;  %vm334_vm2 = vmmov 0  }
   0x6   :  { %44 = vperm.xlu1 %299, %v27_v6   ;;  %v28_v9 = vld [vmem:[%s418_s2 + $0x18] sm:$0xff]  ;;  %v30_v10 = vld [vmem:[%s420_s4] sm:$0x3]  ;;  %287 = vmatprep.subr.bf16.mxu1 %v333_v11  ;;  %v335_v12 = vmov 0.0   ;;  %vm163_vm3 = vcmask 261120   ;;  %s336_s4 = smov [#allocation2]  }
   0x7   :  { %284 = vmatprep.mubr.msk.f32.mxu1 %vm334_vm2, %v335_v12  ;;  %v29_v31 = vld [vmem:[%s419_s3] sm:$0x3]  ;;  %s244_s12 = sshll.u32 %s336_s4, 4  ;;  %s245_s12 = int_to_ptr.vmem [resolvable:$true] %s244_s12 }
   0x8   :  { %274 = vmatmul.mubr.msk.f32.gmra.mrb[2].mxu0 %vm52_vm1, %v24_v7  ;;  %39 = vperm.xlu0 %298, %v26_v8   ;;  %s308_s13 = scalar_lea.vmem %s245_s12, 32  ;;  %p313_p1 = scmp.lt.s32.totalorder %s245_s12, %s245_s12 }
   0x9   :  { %p309_p0 = scmp.ne.s32.totalorder %s245_s12, %s308_s13  ;;  %p314_p2 = scmp.lt.s32.totalorder %s308_s13, %s308_s13 }
   0xa   :  { %49 = vperm.xlu1 %299, %v28_v9  }
   0xb   :  { %p315_p3 = por %p314_p2, %p313_p1 }
   0xc   :  { %160 = vperm.xlu0 %298, %v30_v10  }
   0xd   :  { %p316_p4 = pnand %p315_p3, %p309_p0 }
  0x83   :  { %v35_v13 = vpop.permute.xlu0 %34 }
  0x85   :  { %v45_v14 = vpop.permute.xlu1 %44 }
  0x87   :  { %v40_v15 = vpop.permute.xlu0 %39 }
  0x89   :  { %v50_v20 = vpop.permute.xlu1 %49 }
  0x8b   :  { %v161_v32 = vpop.permute.xlu0 %160 }
  0xd7   :  { %v272_v16 = vpop.f32.mrb[0].mxu0 }
  0xd8   :  { %v141_v17 = vadd.f32 %v272_v16, %v40_v15  ;;  %v135_v18 = vpop.f32.mrb[1].mxu0 }
  0xd9   :  { %v136_v19 = vadd.f32 %v135_v18, %v35_v13 }
  0xda   :  { %300 = vtanh.f32 %v141_v17 }
  0xdb   :  { %302 = vtanh.f32 %v136_v19  ;;  %v275_v21 = vpop.f32.mrb[2].mxu0 }
  0xdc   :  { %v151_v22 = vadd.f32 %v275_v21, %v50_v20  ;;  %v145_v23 = vpop.f32.mrb[3].mxu0 }
  0xdd   :  { %v146_v24 = vadd.f32 %v145_v23, %v45_v14 }
  0xde   :  { %304 = vtanh.f32 %v151_v22 }
  0xdf   :  { %306 = vtanh.f32 %v146_v24 }
  0xe4   :  { %v301_v25 = vpop.eup %300 }
  0xe5   :  { %v303_v26 = vpop.eup %302 }
  0xe6   :  { %v288_v27 = vpack.c.bf16 %v301_v25, %v303_v26 }
  0xe8   :  { %v305_v28 = vpop.eup %304  ;;  %289 = vmatpush3.bf16.msra.mxu1 %v288_v27 }
  0xe9   :  { %v307_v29 = vpop.eup %306  ;;  %290 = vmatprep.subr.bf16.mxu1 %v333_v11 }
  0xea   :  { %v291_v30 = vpack.c.bf16 %v305_v28, %v307_v29 }
  0xec   :  { %292 = vmatpush3.bf16.msra.mxu1 %v291_v30 }
  0xef   :  { %285 = vmatmul.mubr.msk.f32.vlgmr.msra.gmra.mrb[0].mxu1 %vm163_vm3, %v29_v31 }
 0x1c2   :  { %v233_v33 = vpop.f32.mrb[0].mxu1 }
 0x1c3   :  { %v234_v34 = vadd.f32 %v233_v33, %v161_v32  ;;  %v286_v35 = vpop.f32.mrb[1].mxu1 }
 0x1c5   :  { %237 = vst [vmem:[#allocation2] sm:$0x3] %v234_v34 }
 0x1c6   :  { %319 = shalt.err (!%p316_p4)
}
 0x1c7   :  { %s320_s3 = scalar_lea.hbm %s421_s5, 32 }
 0x1c8   :  { %p321_p5 = scmp.ne.s32.totalorder %s421_s5, %s320_s3  ;;  %p324_p6 = scmp.lt.u32.totalorder %s320_s3, %s421_s5 }
 0x1ca   :  { %p326_p7 = pnand %p324_p6, %p321_p5 }
 0x1cc   :  { %329 = shalt.err (!%p326_p7)
}
 0x1cd   :  { %247 = dma.vmem_to_hbm [thread:$0]  %s245_s12, 32, %s421_s5, [#allocation3]  }
 0x1ce   :  { %330 = dma.done.wait [#allocation3], 32  }
 0x1cf   :  { %331 = vsyncadd [#allocation3], 4294967264 }
 0x1d0   :  { %251 = vsyncpa [#allocation3], 1 }

</bundles_post_ra>
